<compile_context>
chip_gen: v5e
topology: v5e:2x2
jax: 0.10.0
libtpu: 0.0.40
codegen_flags: <defaults>
</compile_context>

<pallas_src>
import math

import jax
import jax.numpy as jnp
from jax.experimental import pallas as pl
from jax.experimental.pallas import tpu as pltpu


def _self_attention_kernel(w_ref, h_ref, m_ref, rep_ref, attn_ref):
    # w_ref:    (1, H)      attention weight vector (resident across the grid)
    # h_ref:    (TB, L, H)  TB batch rows of hidden states (caller dtype)
    # m_ref:    (TB, L)     TB rows of the attention mask
    # rep_ref:  (TB, H)     pooled representations (f32, lane-dense output)
    # attn_ref: (TB, L)     masked, renormalized attention weights (f32)
    h = h_ref[...].astype(jnp.float32)      # cast right after load; f32 accumulate
    w = w_ref[0, :].astype(jnp.float32)     # (H,)
    m = m_ref[...].astype(jnp.float32)      # (TB, L)

    # scores = <h, w> along H: VPU multiply + lane reduce (no M=1 MXU GEMV).
    s = jnp.sum(h * w, axis=-1)             # (TB, L)

    # softmax(tanh(scores), axis=-1)
    t = jnp.tanh(s)
    t = t - jnp.max(t, axis=-1, keepdims=True)
    e = jnp.exp(t)
    attn = e / jnp.sum(e, axis=-1, keepdims=True)             # (TB, L)

    # masked renormalization: attn = (attn * mask) / sum(attn * mask)
    # (same behavior as the PyTorch module, incl. NaN on fully-masked rows)
    masked = attn * m
    attn = masked / jnp.sum(masked, axis=-1, keepdims=True)   # (TB, L)
    attn_ref[...] = attn.astype(attn_ref.dtype)

    # representations = sum_l attn[:, l] * h[:, l, :]
    # VPU multiply + sublane reduce, result stays (TB, H) lane-dense.
    rep_ref[...] = jnp.sum(h * attn[:, :, None], axis=1).astype(rep_ref.dtype)


def self_attention(hidden_states, attention_mask, att_weights):
    """hidden_states: [B, L, H] (f32 or bf16), attention_mask: [B, L],
    att_weights: [1, H].  Returns (representations [B, H] f32,
    attentions [B, L] f32)."""
    B, L, H = hidden_states.shape
    in_bytes = jnp.dtype(hidden_states.dtype).itemsize

    # --- generation-aware VMEM budget (v5e/v6e: 128 MiB, v7x: 64 MiB) -------
    vmem_cap = 64 * 1024 * 1024  # conservative fallback (v7x-sized)
    try:
        info = pltpu.get_tpu_info()
        vmem_cap = int(getattr(info, "vmem_capacity_bytes", vmem_cap))
    except Exception:
        pass

    # Worst-case per-batch-row VMEM bytes: double-buffered hidden tile +
    # an f32 copy of h + (possibly unfused) products of the two reductions
    # + small per-row vectors.
    per_row = (2 * L * H * in_bytes      # hidden tile, double-buffered
               + 3 * L * H * 4           # f32 cast + 2 potential product temps
               + 8 * L * 4 + 4 * H * 4)  # mask / attn / rep / small temps
    tile_budget = int(0.45 * vmem_cap)
    vmem_limit = int(0.70 * vmem_cap)
    max_tb_vmem = max(1, tile_budget // per_row)

    # --- pick the batch tile TB ---------------------------------------------
    # Declared block shapes keep their second-minor dim either a multiple of
    # 8 or equal to the full batch dim; ragged *last* blocks (B % TB != 0)
    # are handled by Pallas (padded reads, discarded OOB writes) without any
    # HBM-side concatenate/pad pass.
    if max_tb_vmem >= B:
        if B > 8:
            # Split into >= 2 aligned tiles: both v7x TensorCores get work and
            # DMA / compute / writeback pipeline across grid steps.
            TB = min(B, ((pl.cdiv(B, 2) + 7) // 8) * 8)
        else:
            # Tiny batch: one full tile (splitting would misalign block shapes
            # and the work is negligible anyway).
            TB = B
    else:
        # VMEM-limited: take the largest tile that fits (multiple of 8 when
        # possible, otherwise whatever fits — never force it up to 8).
        TB = (max_tb_vmem // 8) * 8 if max_tb_vmem >= 8 else max_tb_vmem

    grid = (pl.cdiv(B, TB),)

    rep, attn = pl.pallas_call(
        _self_attention_kernel,
        out_shape=(
            jax.ShapeDtypeStruct((B, H), jnp.float32),
            jax.ShapeDtypeStruct((B, L), jnp.float32),
        ),
        grid_spec=pltpu.PrefetchScalarGridSpec(
            num_scalar_prefetch=0,
            grid=grid,
            in_specs=[
                pl.BlockSpec((1, H), lambda b: (0, 0)),         # att_weights (resident)
                pl.BlockSpec((TB, L, H), lambda b: (b, 0, 0)),  # hidden_states
                pl.BlockSpec((TB, L), lambda b: (b, 0)),        # attention_mask
            ],
            out_specs=[
                pl.BlockSpec((TB, H), lambda b: (b, 0)),        # representations
                pl.BlockSpec((TB, L), lambda b: (b, 0)),        # attentions
            ],
        ),
        compiler_params=pltpu.CompilerParams(
            dimension_semantics=("parallel",),  # shard batch tiles on v7x's 2 TCs
            vmem_limit_bytes=vmem_limit,
        ),
    )(att_weights, hidden_states, attention_mask)

    return rep, attn


def _xavier_uniform(key, shape):
    # matches nn.init.xavier_uniform_ for a 2D (fan_out, fan_in) tensor
    fan_out, fan_in = shape
    bound = math.sqrt(6.0 / (fan_in + fan_out))
    return jax.random.uniform(key, shape, jnp.float32, minval=-bound, maxval=bound)


def _reference(hidden_states, attention_mask, att_weights):
    # pure-JAX reference reproducing the PyTorch forward (f32 math)
    h = hidden_states.astype(jnp.float32)
    m = attention_mask.astype(jnp.float32)
    w = att_weights.astype(jnp.float32)
    scores = jnp.sum(h * w[0], axis=-1)
    attn = jax.nn.softmax(jnp.tanh(scores), axis=-1)
    masked = attn * m
    attn = masked / jnp.sum(masked, axis=-1, keepdims=True)
    rep = jnp.sum(h * attn[..., None], axis=1)
    return rep, attn


if __name__ == "__main__":
    B, L, H = 2, 8, 32

    key = jax.random.PRNGKey(0)
    k_w, k_h, k_m = jax.random.split(key, 3)

    att_weights = _xavier_uniform(k_w, (1, H))
    hidden_states = jax.random.normal(k_h, (B, L, H), jnp.float32)
    # binary attention mask with some positions masked out
    attention_mask = (jax.random.uniform(k_m, (B, L)) > 0.3).astype(jnp.float32)
    # make sure at least one position per row is unmasked
    attention_mask = attention_mask.at[:, 0].set(1.0)

    # f32 input path
    rep, attn = self_attention(hidden_states, attention_mask, att_weights)
    jax.block_until_ready((rep, attn))
    rep_ref, attn_ref = _reference(hidden_states, attention_mask, att_weights)
    assert jnp.allclose(rep, rep_ref, atol=1e-5, rtol=1e-5), "representations mismatch (f32)"
    assert jnp.allclose(attn, attn_ref, atol=1e-5, rtol=1e-5), "attentions mismatch (f32)"

    # bf16 input path: kernel reads bf16 from HBM and accumulates in f32
    hs_bf16 = hidden_states.astype(jnp.bfloat16)
    rep_b, attn_b = self_attention(hs_bf16, attention_mask, att_weights)
    jax.block_until_ready((rep_b, attn_b))
    rep_ref_b, attn_ref_b = _reference(hs_bf16, attention_mask, att_weights)
    assert jnp.allclose(rep_b, rep_ref_b, atol=1e-5, rtol=1e-5), "representations mismatch (bf16)"
    assert jnp.allclose(attn_b, attn_ref_b, atol=1e-5, rtol=1e-5), "attentions mismatch (bf16)"

    print("KERNEL_OK")
</pallas_src>

<mosaic_0001>
module attributes {stable_mosaic.version = 11 : i64} {
  func.func @_self_attention_kernel(%arg0: i32, %arg1: memref<1x32xf32, #tpu.memory_space<vmem>>, %arg2: memref<2x8x32xf32, #tpu.memory_space<vmem>>, %arg3: memref<2x8xf32, #tpu.memory_space<vmem>>, %arg4: memref<2x32xf32, #tpu.memory_space<vmem>>, %arg5: memref<2x8xf32, #tpu.memory_space<vmem>>) attributes {dimension_semantics = [#tpu.dimension_semantics<parallel>], iteration_bounds = array<i64: 1>, scalar_prefetch = 0 : i64, scratch_operands = 0 : i64, tpu.core_type = #tpu.core_type<tc>, window_params = [{pipeline_mode = #tpu.pipeline_mode<synchronous>, transform_indices = @transform_0, window_bounds = array<i64: 1, 32>}, {transform_indices = @transform_1, window_bounds = array<i64: 2, 8, 32>}, {transform_indices = @transform_2, window_bounds = array<i64: 2, 8>}, {transform_indices = @transform_3, window_bounds = array<i64: 2, 32>}, {transform_indices = @transform_4, window_bounds = array<i64: 2, 8>}]} {
    %c0 = arith.constant 0 : index
    %c0_0 = arith.constant 0 : index
    %c0_1 = arith.constant 0 : index
    %0 = vector.load %arg2[%c0, %c0_0, %c0_1] : memref<2x8x32xf32, #tpu.memory_space<vmem>>, vector<2x8x32xf32>
    %c0_2 = arith.constant 0 : index
    %c0_3 = arith.constant 0 : index
    %1 = vector.load %arg1[%c0_2, %c0_3] : memref<1x32xf32, #tpu.memory_space<vmem>>, vector<1x32xf32>
    %2 = vector.shape_cast %1 : vector<1x32xf32> to vector<32xf32>
    %c0_4 = arith.constant 0 : index
    %c0_5 = arith.constant 0 : index
    %3 = vector.load %arg3[%c0_4, %c0_5] : memref<2x8xf32, #tpu.memory_space<vmem>>, vector<2x8xf32>
    %4 = vector.shape_cast %2 : vector<32xf32> to vector<1x1x32xf32>
    %5 = vector.broadcast %4 : vector<1x1x32xf32> to vector<2x8x32xf32>
    %6 = arith.mulf %0, %5 : vector<2x8x32xf32>
    %cst = arith.constant dense<0.000000e+00> : vector<2x8xf32>
    %7 = vector.multi_reduction <add>, %6, %cst [2] : vector<2x8x32xf32> to vector<2x8xf32>
    %8 = math.tanh %7 : vector<2x8xf32>
    %cst_6 = arith.constant dense<0xFF800000> : vector<2xf32>
    %9 = vector.multi_reduction <maximumf>, %8, %cst_6 [1] : vector<2x8xf32> to vector<2xf32>
    %10 = vector.shape_cast %9 : vector<2xf32> to vector<2x1xf32>
    %11 = vector.broadcast %10 : vector<2x1xf32> to vector<2x8xf32>
    %12 = arith.subf %8, %11 : vector<2x8xf32>
    %13 = math.exp %12 : vector<2x8xf32>
    %cst_7 = arith.constant dense<0.000000e+00> : vector<2xf32>
    %14 = vector.multi_reduction <add>, %13, %cst_7 [1] : vector<2x8xf32> to vector<2xf32>
    %15 = vector.shape_cast %14 : vector<2xf32> to vector<2x1xf32>
    %16 = vector.broadcast %15 : vector<2x1xf32> to vector<2x8xf32>
    %17 = arith.divf %13, %16 : vector<2x8xf32>
    %18 = arith.mulf %17, %3 : vector<2x8xf32>
    %cst_8 = arith.constant dense<0.000000e+00> : vector<2xf32>
    %19 = vector.multi_reduction <add>, %18, %cst_8 [1] : vector<2x8xf32> to vector<2xf32>
    %20 = vector.shape_cast %19 : vector<2xf32> to vector<2x1xf32>
    %21 = vector.broadcast %20 : vector<2x1xf32> to vector<2x8xf32>
    %22 = arith.divf %18, %21 : vector<2x8xf32>
    %c0_9 = arith.constant 0 : index
    %c0_10 = arith.constant 0 : index
    %23 = vector.load %arg5[%c0_9, %c0_10] : memref<2x8xf32, #tpu.memory_space<vmem>>, vector<2x8xf32>
    tpu.vector_store %arg5[%c0_9, %c0_10], %22 {strides = array<i32>} : memref<2x8xf32, #tpu.memory_space<vmem>>, vector<2x8xf32>,
    %24 = vector.shape_cast %22 : vector<2x8xf32> to vector<2x8x1xf32>
    %25 = vector.broadcast %24 : vector<2x8x1xf32> to vector<2x8x32xf32>
    %26 = arith.mulf %0, %25 : vector<2x8x32xf32>
    %cst_11 = arith.constant dense<0.000000e+00> : vector<2x32xf32>
    %27 = vector.multi_reduction <add>, %26, %cst_11 [1] : vector<2x8x32xf32> to vector<2x32xf32>
    %c0_12 = arith.constant 0 : index
    %c0_13 = arith.constant 0 : index
    %28 = vector.load %arg4[%c0_12, %c0_13] : memref<2x32xf32, #tpu.memory_space<vmem>>, vector<2x32xf32>
    tpu.vector_store %arg4[%c0_12, %c0_13], %27 {strides = array<i32>} : memref<2x32xf32, #tpu.memory_space<vmem>>, vector<2x32xf32>,
    return
  }
  func.func @transform_0(%arg0: i32) -> (i32, i32) {
    %c0_i32 = arith.constant 0 : i32
    %c0_i32_0 = arith.constant 0 : i32
    %c0_i32_1 = arith.constant 0 : i32
    return %c0_i32, %c0_i32_0 : i32, i32
  }
  func.func @transform_1(%arg0: i32) -> (i32, i32, i32) {
    %c0_i32 = arith.constant 0 : i32
    %c0_i32_0 = arith.constant 0 : i32
    %c0_i32_1 = arith.constant 0 : i32
    return %arg0, %c0_i32, %c0_i32_0 : i32, i32, i32
  }
  func.func @transform_2(%arg0: i32) -> (i32, i32) {
    %c0_i32 = arith.constant 0 : i32
    %c0_i32_0 = arith.constant 0 : i32
    return %arg0, %c0_i32 : i32, i32
  }
  func.func @transform_3(%arg0: i32) -> (i32, i32) {
    %c0_i32 = arith.constant 0 : i32
    %c0_i32_0 = arith.constant 0 : i32
    return %arg0, %c0_i32 : i32, i32
  }
  func.func @transform_4(%arg0: i32) -> (i32, i32) {
    %c0_i32 = arith.constant 0 : i32
    %c0_i32_0 = arith.constant 0 : i32
    return %arg0, %c0_i32 : i32, i32
  }
}

</mosaic_0001>

<bundles_post_ra>
// kernel: tpu_custom_call.1
= control target key start
LH: loop header
LB: loop body
LE: loop exit
PB: predicated region body
PF: predicated region fallthrough
CT: control target
= control target key end

     0   :  { %10 = vsyncpa [#allocation3], 0  ;;  %s531_s0 = inlined_call_operand.hbm [shape: f32[1,32], index: 0, kind: input, shape index: {}]   ;;  %s532_s1 = inlined_call_operand.hbm [shape: f32[2,8,32], index: 1, kind: input, shape index: {}]   ;;  %s533_s2 = inlined_call_operand.hbm [shape: f32[2,8], index: 2, kind: input, shape index: {}]   ;;  %s534_s3 = inlined_call_operand.hbm [shape: f32[2,32], index: 3, kind: output, shape index: {0}]   ;;  %s535_s4 = inlined_call_operand.hbm [shape: f32[2,8], index: 4, kind: output, shape index: {1}]  }
   0x1   :  { %11 = vsyncpa [#allocation6], 0 }
   0x2   :  { %12 = vsyncpa [#allocation4], 0  ;;  %s29_s17 = sshll.u32 %s532_s1, 4  ;;  %s30_s17 = int_to_ptr.hbm [resolvable:$true] %s29_s17 }
   0x3   :  { %13 = vsyncpa [#allocation10], 0  ;;  %s452_s18 = smov [#allocation5]   ;;  %s19_s22 = sshll.u32 %s531_s0, 4  ;;  %s20_s22 = int_to_ptr.hbm [resolvable:$true] %s19_s22 }
   0x4   :  { %s31_s19 = sshll.u32 %s452_s18, 4  ;;  %s453_s23 = smov 128   ;;  %s32_s19 = int_to_ptr.vmem [resolvable:$true] %s31_s19 }
   0x5   :  { %s454_s24 = smov 8   ;;  %s455_s25 = smov [#allocation2]  }
   0x6   :  { %37 = dma.hbm_to_vmem [thread:$0]  %s30_s17, 256, %s32_s19, [#allocation6], %s453_s23, %s453_s23, %s454_s24  }
   0x7   :  { %s21_s26 = sshll.u32 %s455_s25, 4  ;;  %s43_s29 = sshll.u32 %s533_s2, 4  ;;  %s22_s26 = int_to_ptr.vmem [resolvable:$true] %s21_s26  ;;  %s44_s29 = int_to_ptr.hbm [resolvable:$true] %s43_s29 }
   0x8   :  { %24 = dma.hbm_to_vmem [thread:$0]  %s20_s22, 16, %s22_s26, [#allocation3]  }
   0x9   :  { %s456_s1 = smov [#allocation7]  }
   0xa   :  { %s45_s30 = sshll.u32 %s456_s1, 4  ;;  %s46_s30 = int_to_ptr.vmem [resolvable:$true] %s45_s30 }
   0xb   :  { %48 = dma.hbm_to_vmem [thread:$0]  %s44_s29, 32, %s46_s30, [#allocation6]  }
   0xc   :  { %444 = dma.done.wait [#allocation3], 16  }
   0xd   :  { %445 = vsyncadd [#allocation3], 4294967280 }
   0xe   :  { %446 = dma.done.wait [#allocation6], 288  }
   0xf   :  { %447 = vsyncadd [#allocation6], 4294967008  ;;  %v494_v0 = vld [vmem:[#allocation5] sm:$0xff]  ;;  %v307_v1 = vld [vmem:[#allocation2] ss:$0 sm:$0xff]  ;;  %vm70_vm0 = vcmask 261120   ;;  %v81_v9 = vlaneseq }
  0x10   :  { %v68_v2 = vmul.f32 %v307_v1, %v494_v0  ;;  %v497_v3 = vld [vmem:[#allocation5 + $0x8] sm:$0xff]  ;;  %vm85_vm1 = vcmask 1041409   ;;  %vm88_vm2 = vcmask 58368   ;;  %v457_v17 = vmov 0   ;;  %v64_v28 = vld [vmem:[#allocation7] sm:$0x3] }
  0x11   :  { %v69_v5 = vmul.f32 %v307_v1, %v497_v3  ;;  %v502_v10 = vand.u32 127, %v81_v9  ;;  %302 = vset.pattern.permute.xlu2 %v457_v17  ;;  %301 = vset.pattern.permute.xlu1 %v457_v17  ;;  %v156_v27 = vshrl.u32 %v81_v9, 7  ;;  %v154_v29 = vperm.slane %v64_v28, 0  ;;  %s458_s0 = smov [#allocation9]   ;;  %s277_s7 = sshll.u32 %s535_s4, 4  ;;  %s278_s7 = int_to_ptr.hbm [resolvable:$true] %s277_s7 }
  0x12   :  { %v71_v4 = vsel %vm70_vm0, %v68_v2, 0.0  ;;  %v161_v30 = vperm.slane %v64_v28, 1  ;;  %s275_s2 = sshll.u32 %s458_s0, 4  ;;  %s459_s4 = smov [#allocation8]   ;;  %s276_s2 = int_to_ptr.vmem [resolvable:$true] %s275_s2 }
  0x13   :  { %72 = vadd.xlane.f32.xlu0 %v71_v4  ;;  %v74_v6 = vsel %vm70_vm0, %v69_v5, 0.0  ;;  %s264_s8 = sshll.u32 %s459_s4, 4  ;;  %s266_s11 = sshll.u32 %s534_s3, 4  ;;  %s265_s8 = int_to_ptr.vmem [resolvable:$true] %s264_s8  ;;  %s267_s11 = int_to_ptr.hbm [resolvable:$true] %s266_s11 }
  0x14   :  { %303 = vset.pattern.permute.xlu0 %v156_v27 }
  0x1b   :  { %75 = vadd.xlane.f32.xlu0 %v74_v6 }
  0x2f   :  { %159 = vperm.xlu0 %303, %v154_v29  }
  0x37   :  { %306 = vset.pattern.permute.xlu0 %v457_v17 }
  0x86   :  { %v73_v7 = vpop.xlane.xlu0 %72 }
  0x87   :  { %308 = vtanh.f32 %v73_v7 }
  0x8d   :  { %v309_v11 = vpop.eup %308 }
  0x8e   :  { %v76_v8 = vpop.xlane.xlu0 %75  ;;  %v83_v13 = vperm.slane %v309_v11, %v502_v10 }
  0x8f   :  { %310 = vtanh.f32 %v76_v8 }
  0x95   :  { %v311_v12 = vpop.eup %310 }
  0x96   :  { %v84_v14 = vperm.slane %v311_v12, %v502_v10 }
  0x98   :  { %v86_v15 = vsel %vm85_vm1, %v84_v14, %v83_v13 }
  0x99   :  { %v89_v16 = vsel %vm88_vm2, %v86_v15, -inf }
  0x9a   :  { %90 = vmax.xlane.f32.xlu1 %v89_v16 }
  0xa1   :  { %v160_v57 = vpop.permute.xlu0 %159 }
 0x10d   :  { %v91_v18 = vpop.xlane.xlu1 %90 }
 0x10e   :  { %v93_v19 = vperm.slane %v91_v18, 0  ;;  %v94_v20 = vperm.slane %v91_v18, 1 }
 0x110   :  { %v97_v21 = vsub.f32 %v309_v11, %v93_v19  ;;  %v98_v22 = vsub.f32 %v311_v12, %v94_v20 }
 0x112   :  { %v99_v23 = vmul.f32 1.442695, %v97_v21  ;;  %v101_v24 = vmul.f32 1.442695, %v98_v22 }
 0x114   :  { %312 = vpow2.f32 %v99_v23 }
 0x115   :  { %314 = vpow2.f32 %v101_v24 }
 0x11a   :  { %v313_v25 = vpop.eup %312 }
 0x11b   :  { %v315_v26 = vpop.eup %314  ;;  %106 = vperm.xlu1 %301, %v313_v25  }
 0x11c   :  { %109 = vperm.xlu2 %302, %v315_v26  }
 0x123   :  { %304 = vset.pattern.permute.xlu1 %v156_v27 }
 0x12b   :  { %166 = vperm.xlu1 %304, %v161_v30  }
 0x133   :  { %305 = vset.pattern.permute.xlu1 %v457_v17 }
 0x176   :  { %v110_v31 = vpop.permute.xlu2 %109 }
 0x177   :  { %v112_v33 = vperm.slane %v110_v31, %v502_v10 }
 0x18d   :  { %v107_v32 = vpop.permute.xlu1 %106 }
 0x18e   :  { %v111_v34 = vperm.slane %v107_v32, %v502_v10 }
 0x190   :  { %v113_v35 = vsel %vm85_vm1, %v112_v33, %v111_v34 }
 0x191   :  { %v115_v36 = vsel %vm88_vm2, %v113_v35, 0.0 }
 0x192   :  { %116 = vadd.xlane.f32.xlu2 %v115_v36 }
 0x19d   :  { %v167_v1 = vpop.permute.xlu1 %166 }
 0x205   :  { %v117_v37 = vpop.xlane.xlu2 %116 }
 0x206   :  { %v119_v38 = vperm.slane %v117_v37, 0  ;;  %v120_v39 = vperm.slane %v117_v37, 1 }
 0x208   :  { %316 = vrcp.f32 %v119_v38  ;;  %v134_v46 = vand.u32 2147483648, %v119_v38  ;;  %v132_v48 = vand.u32 2147483647, %v119_v38  ;;  %vm128_vm5 = vweird.f32 %v119_v38 }
 0x209   :  { %318 = vrcp.f32 %v120_v39  ;;  %v149_v52 = vand.u32 2147483648, %v120_v39  ;;  %vm143_vm7 = vweird.f32 %v120_v39  ;;  %v147_v54 = vand.u32 2147483647, %v120_v39 }
 0x20a   :  { %v135_v53 = vor.u32 1.1754944e-38, %v134_v46  ;;  %vm133_vm8 = vcmp.eq.f32.partialorder %v132_v48, 8.507059e+37 }
 0x20b   :  { %v150_v60 = vor.u32 1.1754944e-38, %v149_v52  ;;  %vm148_vm10 = vcmp.eq.f32.partialorder %v147_v54, 8.507059e+37 }
 0x20e   :  { %v317_v40 = vpop.eup %316 }
 0x20f   :  { %v319_v41 = vpop.eup %318  ;;  %v124_v42 = vmul.f32 %v317_v40, %v119_v38  ;;  %vm129_vm3 = vweird.f32 %v317_v40 }
 0x210   :  { %v139_v43 = vmul.f32 %v319_v41, %v120_v39  ;;  %vm144_vm4 = vweird.f32 %v319_v41  ;;  %vm130_vm6 = vmor %vm128_vm5, %vm129_vm3 }
 0x211   :  { %v125_v44 = vsub.f32 1.0, %v124_v42  ;;  %vm145_vm9 = vmor %vm143_vm7, %vm144_vm4 }
 0x212   :  { %v140_v45 = vsub.f32 1.0, %v139_v43 }
 0x213   :  { %v126_v47 = vmul.f32 %v317_v40, %v125_v44 }
 0x214   :  { %v141_v49 = vmul.f32 %v319_v41, %v140_v45 }
 0x215   :  { %v127_v50 = vadd.f32 %v317_v40, %v126_v47 }
 0x216   :  { %v142_v51 = vadd.f32 %v319_v41, %v141_v49 }
 0x217   :  { %v131_v55 = vsel %vm130_vm6, %v317_v40, %v127_v50 }
 0x218   :  { %v136_v56 = vsel %vm133_vm8, %v135_v53, %v131_v55  ;;  %v146_v58 = vsel %vm145_vm9, %v319_v41, %v142_v51 }
 0x219   :  { %v137_v59 = vmul.f32 %v313_v25, %v136_v56  ;;  %v151_v62 = vsel %vm148_vm10, %v150_v60, %v146_v58 }
 0x21a   :  { %v152_v63 = vmul.f32 %v315_v26, %v151_v62 }
 0x21b   :  { %v170_v61 = vmul.f32 %v160_v57, %v137_v59 }
 0x21c   :  { %v171_v2 = vmul.f32 %v167_v1, %v152_v63 }
 0x21d   :  { %175 = vperm.xlu1 %305, %v170_v61  }
 0x225   :  { %178 = vperm.xlu1 %305, %v171_v2  }
 0x28f   :  { %v176_v4 = vpop.permute.xlu1 %175 }
 0x290   :  { %v180_v6 = vperm.slane %v176_v4, %v502_v10 }
 0x297   :  { %v179_v5 = vpop.permute.xlu1 %178 }
 0x298   :  { %v181_v7 = vperm.slane %v179_v5, %v502_v10 }
 0x29a   :  { %v182_v8 = vsel %vm85_vm1, %v181_v7, %v180_v6 }
 0x29b   :  { %v184_v9 = vsel %vm88_vm2, %v182_v8, 0.0 }
 0x29c   :  { %185 = vadd.xlane.f32.xlu2 %v184_v9 }
 0x30f   :  { %v186_v11 = vpop.xlane.xlu2 %185 }
 0x310   :  { %v188_v12 = vperm.slane %v186_v11, 0  ;;  %v189_v13 = vperm.slane %v186_v11, 1 }
 0x312   :  { %320 = vrcp.f32 %v188_v12  ;;  %v203_v20 = vand.u32 2147483648, %v188_v12  ;;  %v218_v21 = vand.u32 2147483648, %v189_v13  ;;  %v201_v23 = vand.u32 2147483647, %v188_v12 }
 0x313   :  { %322 = vrcp.f32 %v189_v13  ;;  %v216_v25 = vand.u32 2147483647, %v189_v13  ;;  %vm197_vm13 = vweird.f32 %v188_v12  ;;  %vm212_vm14 = vweird.f32 %v189_v13 }
 0x314   :  { %v204_v28 = vor.u32 1.1754944e-38, %v203_v20  ;;  %v219_v29 = vor.u32 1.1754944e-38, %v218_v21  ;;  %vm202_vm4 = vcmp.eq.f32.partialorder %v201_v23, 8.507059e+37 }
 0x315   :  { %vm217_vm5 = vcmp.eq.f32.partialorder %v216_v25, 8.507059e+37 }
 0x318   :  { %v321_v14 = vpop.eup %320 }
 0x319   :  { %v323_v15 = vpop.eup %322  ;;  %v193_v16 = vmul.f32 %v321_v14, %v188_v12  ;;  %vm198_vm11 = vweird.f32 %v321_v14 }
 0x31a   :  { %v208_v17 = vmul.f32 %v323_v15, %v189_v13  ;;  %vm213_vm12 = vweird.f32 %v323_v15  ;;  %vm199_vm15 = vmor %vm197_vm13, %vm198_vm11 }
 0x31b   :  { %v194_v18 = vsub.f32 1.0, %v193_v16  ;;  %vm214_vm3 = vmor %vm212_vm14, %vm213_vm12 }
 0x31c   :  { %v209_v19 = vsub.f32 1.0, %v208_v17 }
 0x31d   :  { %v195_v22 = vmul.f32 %v321_v14, %v194_v18 }
 0x31e   :  { %v210_v24 = vmul.f32 %v323_v15, %v209_v19 }
 0x31f   :  { %v196_v26 = vadd.f32 %v321_v14, %v195_v22 }
 0x320   :  { %v211_v27 = vadd.f32 %v323_v15, %v210_v24 }
 0x321   :  { %v200_v30 = vsel %vm199_vm15, %v321_v14, %v196_v26 }
 0x322   :  { %v215_v31 = vsel %vm214_vm3, %v323_v15, %v211_v27  ;;  %v205_v32 = vsel %vm202_vm4, %v204_v28, %v200_v30 }
 0x323   :  { %v220_v33 = vsel %vm217_vm5, %v219_v29, %v215_v31  ;;  %v206_v34 = vmul.f32 %v205_v32, %v170_v61 }
 0x324   :  { %v221_v35 = vmul.f32 %v220_v33, %v171_v2 }
 0x325   :  { %225 = vperm.xlu0 %306, %v206_v34  }
 0x326   :  { %228 = vperm.xlu1 %305, %v221_v35  }
 0x397   :  { %v226_v36 = vpop.permute.xlu0 %225 }
 0x398   :  { %v229_v37 = vpop.permute.xlu1 %228  ;;  %v230_v38 = vperm.slane %v226_v36, %v502_v10  ;;  %v237_v39 = vmul.f32 %v226_v36, %v494_v0 }
 0x399   :  { %v231_v40 = vperm.slane %v229_v37, %v502_v10  ;;  %v238_v41 = vmul.f32 %v229_v37, %v497_v3 }
 0x39a   :  { %v239_v42 = vsel %vm70_vm0, %v237_v39, 0.0 }
 0x39b   :  { %v246_v43 = vsel %vm70_vm0, %v238_v41, 0.0  ;;  %v232_v44 = vsel %vm85_vm1, %v231_v40, %v230_v38  ;;  %v240_v45 = vrot.slane %v239_v42, 4  ;;  %vm257_vm0 = vcmask 254976  }
 0x39c   :  { %v247_v46 = vrot.slane %v246_v43, 4  ;;  %234 = vst.msk [vmem:[#allocation9] sm:$0x3] %vm88_vm2, %v232_v44 }
 0x39d   :  { %v241_v47 = vadd.f32 %v240_v45, %v239_v42  ;;  %280 = dma.vmem_to_hbm [thread:$0]  %s276_s2, 32, %s278_s7, [#allocation10]  }
 0x39e   :  { %v248_v48 = vadd.f32 %v247_v46, %v246_v43 }
 0x39f   :  { %v242_v0 = vrot.slane %v241_v47, 2 }
 0x3a0   :  { %v249_v49 = vrot.slane %v248_v48, 2 }
 0x3a1   :  { %v243_v10 = vadd.f32 %v242_v0, %v241_v47 }
 0x3a2   :  { %v250_v50 = vadd.f32 %v249_v49, %v248_v48 }
 0x3a3   :  { %v244_v3 = vrot.slane %v243_v10, 1 }
 0x3a4   :  { %v251_v51 = vrot.slane %v250_v50, 1 }
 0x3a5   :  { %v245_v52 = vadd.f32 %v244_v3, %v243_v10 }
 0x3a6   :  { %v252_v53 = vadd.f32 %v251_v51, %v250_v50 }
 0x3a8   :  { %v255_v54 = vsel %vm85_vm1, %v252_v53, %v245_v52 }
 0x3a9   :  { %258 = vst.msk [vmem:[#allocation8] sm:$0x3] %vm257_vm0, %v255_v54 }
 0x3aa   :  { %269 = dma.vmem_to_hbm [thread:$0]  %s265_s8, 32, %s267_s11, [#allocation4]  }
 0x3ab   :  { %448 = dma.done.wait [#allocation4], 32  }
 0x3ac   :  { %449 = vsyncadd [#allocation4], 4294967264 }
 0x3ad   :  { %450 = dma.done.wait [#allocation10], 32  }
 0x3ae   :  { %451 = vsyncadd [#allocation10], 4294967264 }
 0x3af   :  { %289 = vsyncpa [#allocation3], 1 }
 0x3b0   :  { %290 = vsyncpa [#allocation6], 1 }
 0x3b1   :  { %291 = vsyncpa [#allocation4], 1 }
 0x3b2   :  { %292 = vsyncpa [#allocation10], 1 }

</bundles_post_ra>
